<compile_context>
chip_gen: v6e
topology: v6e:2x2x1
jax: 0.10.0
libtpu: 0.0.40
codegen_flags: <defaults>
</compile_context>

<pallas_src>
import functools

import jax
import jax.numpy as jnp
from jax.experimental import pallas as pl
from jax.experimental.pallas import tpu as pltpu


# ---------------------------------------------------------------------------
# Kernel: one fused SAGEConv('mean') layer.
# ---------------------------------------------------------------------------
def _sage_layer_kernel(a_ref, xk_ref, xs_ref, invdeg_ref, ws_ref, wn_ref,
                       b_ref, o_ref, acc_ref, *, apply_relu):
    """
    a_ref      : (TM, TK)  exact 0/1 adjacency tile (int8)
    xk_ref     : (TK, Fp)  feature tile for the current reduction slice (bf16)
    xs_ref     : (TM, Fp)  feature tile for the "self" term of this row tile (bf16)
    invdeg_ref : (TM, 1)   per-row 1/deg (f32, 0 for isolated / padded rows)
    ws_ref     : (Fp, Hp)  W_self  (bf16)
    wn_ref     : (Fp, Hp)  W_neigh (bf16)
    b_ref      : (1, Hp)   bias (f32)
    o_ref      : (TM, Hp)  output tile
    acc_ref    : (TM, Fp)  f32 scratch accumulating A @ X across the k axis
    """
    k = pl.program_id(1)

    @pl.when(k == 0)
    def _():
        acc_ref[...] = jnp.zeros_like(acc_ref)

    # Neighbor-sum aggregation: one K-slice of A @ X on the MXU
    # (int8 adjacency upcast to bf16 on the VPU; f32 accumulation).
    acc_ref[...] += jnp.dot(a_ref[...].astype(jnp.bfloat16), xk_ref[...],
                            preferred_element_type=jnp.float32)

    @pl.when(k == pl.num_programs(1) - 1)
    def _():
        # Exact per-row mean normalization in f32, then two separate bf16
        # projections (no concatenate, no f32 round-trip on the self term).
        neigh = (acc_ref[...] * invdeg_ref[...]).astype(jnp.bfloat16)
        h = jnp.dot(xs_ref[...], ws_ref[...], preferred_element_type=jnp.float32)
        h = h + jnp.dot(neigh, wn_ref[...], preferred_element_type=jnp.float32)
        h = h + b_ref[...]
        if apply_relu:
            h = jnp.maximum(h, 0.0)
        o_ref[...] = h.astype(o_ref.dtype)


# ---------------------------------------------------------------------------
# Helpers: padding, tile selection, VMEM budget.
# ---------------------------------------------------------------------------
def _round_up(x, m):
    return ((x + m - 1) // m) * m


def _pad2d(a, rows, cols):
    a = jnp.asarray(a)
    out = jnp.zeros((rows, cols), a.dtype)
    return out.at[:a.shape[0], :a.shape[1]].set(a)


def _pick_tile(n, candidates):
    """Largest candidate that divides n (n is a multiple of 256 by construction)."""
    for t in candidates:
        if t <= n and n % t == 0:
            return t
    return n


def _vmem_limit_bytes():
    """Generation-aware scoped-VMEM budget (~3/4 of physical capacity)."""
    try:
        cap = pltpu.get_tpu_info().vmem_capacity_bytes
    except Exception:
        cap = 64 * 1024 * 1024  # conservative fallback
    return min((cap * 3) // 4, 112 * 1024 * 1024)


def _working_set_bytes(tm, tk, fp, hp, out_itemsize):
    a = tm * tk * 1                      # int8 adjacency tile
    xk = tk * fp * 2                     # bf16
    xs = tm * fp * 2                     # bf16
    idg = tm * 4                         # f32
    w = 2 * fp * hp * 2                  # bf16 (W_self + W_neigh)
    b = hp * 4                           # f32
    out = tm * hp * out_itemsize
    acc = tm * fp * 4                    # f32 scratch (single-buffered)
    return 2 * (a + xk + xs + idg + w + b + out) + acc   # double-buffered I/O


# ---------------------------------------------------------------------------
# One layer = one tiled pallas_call.
# ---------------------------------------------------------------------------
def _sage_layer(a_i8, x, inv_deg, w_self, w_neigh, bias, *,
                apply_relu, out_dtype, tm, tk, vmem_limit):
    n = a_i8.shape[0]
    fp = x.shape[1]
    hp = w_self.shape[1]
    assert n % tm == 0 and n % tk == 0
    grid = (n // tm, n // tk)

    out_itemsize = jnp.dtype(out_dtype).itemsize
    flops = 2 * n * n * fp + 2 * (2 * n * fp * hp)
    bytes_accessed = (a_i8.size
                      + (n // tm) * x.size * 2      # xk re-streamed per row tile
                      + x.size * 2                  # xs
                      + inv_deg.size * 4
                      + (w_self.size + w_neigh.size) * 2
                      + bias.size * 4
                      + n * hp * out_itemsize)

    kernel = functools.partial(_sage_layer_kernel, apply_relu=apply_relu)
    return pl.pallas_call(
        kernel,
        out_shape=jax.ShapeDtypeStruct((n, hp), out_dtype),
        grid_spec=pltpu.PrefetchScalarGridSpec(
            num_scalar_prefetch=0,
            grid=grid,
            in_specs=[
                pl.BlockSpec((tm, tk), lambda i, k: (i, k)),   # A (int8)
                pl.BlockSpec((tk, fp), lambda i, k: (k, 0)),   # X, reduction slice
                pl.BlockSpec((tm, fp), lambda i, k: (i, 0)),   # X, self rows
                pl.BlockSpec((tm, 1), lambda i, k: (i, 0)),    # 1/deg rows
                pl.BlockSpec((fp, hp), lambda i, k: (0, 0)),   # W_self
                pl.BlockSpec((fp, hp), lambda i, k: (0, 0)),   # W_neigh
                pl.BlockSpec((1, hp), lambda i, k: (0, 0)),    # bias
            ],
            out_specs=pl.BlockSpec((tm, hp), lambda i, k: (i, 0)),
            scratch_shapes=[pltpu.VMEM((tm, fp), jnp.float32)],
        ),
        compiler_params=pltpu.CompilerParams(
            dimension_semantics=("parallel", "arbitrary"),
            vmem_limit_bytes=vmem_limit,
        ),
        cost_estimate=pl.CostEstimate(
            flops=flops, transcendentals=0, bytes_accessed=bytes_accessed),
    )(a_i8, x, x, inv_deg, w_self, w_neigh, bias)


# ---------------------------------------------------------------------------
# Two-layer forward (matches the PyTorch/DGL module).
# ---------------------------------------------------------------------------
def graphsage_forward(adj, feats, params):
    n = adj.shape[0]
    f_in = feats.shape[1]
    h_f = params["w_self1"].shape[1]

    # Padded extents: lane-dense F/H, tile-friendly N.
    n_p = _round_up(n, 256)
    f_p = _round_up(f_in, 128)
    h_p = _round_up(h_f, 128)

    # Exact degree / inverse degree in f32 (DGL 'mean': zero if no in-neighbors).
    adj_f32 = adj.astype(jnp.float32)
    deg = jnp.sum(adj_f32, axis=1, keepdims=True)
    inv_deg = jnp.where(deg > 0, 1.0 / jnp.maximum(deg, 1.0), 0.0)

    # Exact 0/1 adjacency as int8 (padded rows/cols are zero; padded 1/deg is zero).
    a_i8 = jnp.zeros((n_p, n_p), jnp.int8).at[:n, :n].set(adj.astype(jnp.int8))
    inv_deg_p = jnp.zeros((n_p, 1), jnp.float32).at[:n, :].set(inv_deg)

    x = jnp.zeros((n_p, f_p), jnp.bfloat16).at[:n, :f_in].set(
        feats.astype(jnp.bfloat16))

    ws1 = _pad2d(params["w_self1"], f_p, h_p).astype(jnp.bfloat16)
    wn1 = _pad2d(params["w_neigh1"], f_p, h_p).astype(jnp.bfloat16)
    b1 = _pad2d(params["b1"].astype(jnp.float32), 1, h_p)
    ws2 = _pad2d(params["w_self2"], h_p, h_p).astype(jnp.bfloat16)
    wn2 = _pad2d(params["w_neigh2"], h_p, h_p).astype(jnp.bfloat16)
    b2 = _pad2d(params["b2"].astype(jnp.float32), 1, h_p)

    # Tile selection: large tiles (fewer grid steps, better DMA efficiency),
    # shrunk only if the double-buffered working set exceeds the VMEM budget.
    vmem_limit = _vmem_limit_bytes()
    tm = _pick_tile(n_p, (512, 256))
    tk = _pick_tile(n_p, (2048, 1024, 512, 256))
    max_f = max(f_p, h_p)
    while (_working_set_bytes(tm, tk, max_f, h_p, 4) > vmem_limit and tk > 256):
        tk //= 2
    while (_working_set_bytes(tm, tk, max_f, h_p, 4) > vmem_limit and tm > 256):
        tm //= 2

    h1 = _sage_layer(a_i8, x, inv_deg_p, ws1, wn1, b1,
                     apply_relu=True, out_dtype=jnp.bfloat16,
                     tm=tm, tk=tk, vmem_limit=vmem_limit)
    h2 = _sage_layer(a_i8, h1, inv_deg_p, ws2, wn2, b2,
                     apply_relu=False, out_dtype=jnp.float32,
                     tm=tm, tk=tk, vmem_limit=vmem_limit)
    return h2[:n, :h_f]


def graphsage_reference(adj, feats, params):
    """Pure-JAX f32 reference with the original (DGL 'mean' SAGEConv) semantics."""
    deg = jnp.sum(adj, axis=1, keepdims=True)
    inv_deg = jnp.where(deg > 0, 1.0 / jnp.maximum(deg, 1.0), 0.0)
    n1 = (adj @ feats) * inv_deg
    h1 = jnp.maximum(
        feats @ params["w_self1"] + n1 @ params["w_neigh1"] + params["b1"], 0.0)
    n2 = (adj @ h1) * inv_deg
    return h1 @ params["w_self2"] + n2 @ params["w_neigh2"] + params["b2"]


def init_params(key, in_feats, h_feats):
    ks = jax.random.split(key, 4)
    s1 = (6.0 / (in_feats + h_feats)) ** 0.5
    s2 = (6.0 / (h_feats + h_feats)) ** 0.5
    return {
        "w_self1": jax.random.uniform(ks[0], (in_feats, h_feats), jnp.float32, -s1, s1),
        "w_neigh1": jax.random.uniform(ks[1], (in_feats, h_feats), jnp.float32, -s1, s1),
        "b1": jnp.zeros((1, h_feats), jnp.float32),
        "w_self2": jax.random.uniform(ks[2], (h_feats, h_feats), jnp.float32, -s2, s2),
        "w_neigh2": jax.random.uniform(ks[3], (h_feats, h_feats), jnp.float32, -s2, s2),
        "b2": jnp.zeros((1, h_feats), jnp.float32),
    }


if __name__ == "__main__":
    N, IN_FEATS, H_FEATS = 128, 32, 32

    key = jax.random.PRNGKey(0)
    k_adj, k_x, k_p = jax.random.split(key, 3)

    # Random sparse-ish directed graph as a dense 0/1 adjacency (no self loops).
    adj = (jax.random.uniform(k_adj, (N, N)) < 0.05).astype(jnp.float32)
    adj = adj * (1.0 - jnp.eye(N, dtype=jnp.float32))

    feats = jax.random.normal(k_x, (N, IN_FEATS), jnp.float32)
    params = init_params(k_p, IN_FEATS, H_FEATS)

    out = graphsage_forward(adj, feats, params)
    jax.block_until_ready(out)

    ref = graphsage_reference(adj, feats, params)
    assert out.shape == (N, H_FEATS)
    # Features / weights / h1 run through the MXU in bf16 (f32 accumulation,
    # exact int8 adjacency, exact f32 1/deg), so compare at bf16-level tolerance.
    assert jnp.allclose(out, ref, atol=5e-2, rtol=5e-2), "mismatch vs reference"

    print("KERNEL_OK")
</pallas_src>

<mosaic_0001>
module attributes {stable_mosaic.version = 11 : i64} {
  func.func @_sage_layer_kernel(%arg0: i32, %arg1: i32, %arg2: memref<256x256xi8, #tpu.memory_space<vmem>>, %arg3: memref<256x128xbf16, #tpu.memory_space<vmem>>, %arg4: memref<256x128xbf16, #tpu.memory_space<vmem>>, %arg5: memref<256x1xf32, #tpu.memory_space<vmem>>, %arg6: memref<128x128xbf16, #tpu.memory_space<vmem>>, %arg7: memref<128x128xbf16, #tpu.memory_space<vmem>>, %arg8: memref<1x128xf32, #tpu.memory_space<vmem>>, %arg9: memref<256x128xbf16, #tpu.memory_space<vmem>>, %arg10: memref<256x128xf32, #tpu.memory_space<vmem>>) attributes {dimension_semantics = [#tpu.dimension_semantics<parallel>, #tpu.dimension_semantics<arbitrary>], iteration_bounds = array<i64: 1, 1>, scalar_prefetch = 0 : i64, scratch_operands = 1 : i64, tpu.core_type = #tpu.core_type<tc>, window_params = [{transform_indices = @transform_0, window_bounds = array<i64: 256, 256>}, {transform_indices = @transform_1, window_bounds = array<i64: 256, 128>}, {transform_indices = @transform_2, window_bounds = array<i64: 256, 128>}, {transform_indices = @transform_3, window_bounds = array<i64: 256, 1>}, {pipeline_mode = #tpu.pipeline_mode<synchronous>, transform_indices = @transform_4, window_bounds = array<i64: 128, 128>}, {pipeline_mode = #tpu.pipeline_mode<synchronous>, transform_indices = @transform_5, window_bounds = array<i64: 128, 128>}, {pipeline_mode = #tpu.pipeline_mode<synchronous>, transform_indices = @transform_6, window_bounds = array<i64: 1, 128>}, {transform_indices = @transform_7, window_bounds = array<i64: 256, 128>}]} {
    %c0_i32 = arith.constant 0 : i32
    %0 = arith.cmpi eq, %arg1, %c0_i32 : i32
    %1 = arith.extui %0 : i1 to i32
    %c0_i32_0 = arith.constant 0 : i32
    %2 = arith.cmpi ne, %1, %c0_i32_0 : i32
    scf.if %2 {
      %cst_10 = arith.constant 0.000000e+00 : f32
      %13 = vector.broadcast %cst_10 : f32 to vector<256x128xf32>
      %c0_11 = arith.constant 0 : index
      %c0_12 = arith.constant 0 : index
      %14 = vector.load %arg10[%c0_11, %c0_12] : memref<256x128xf32, #tpu.memory_space<vmem>>, vector<256x128xf32>
      tpu.vector_store %arg10[%c0_11, %c0_12], %13 {strides = array<i32>} : memref<256x128xf32, #tpu.memory_space<vmem>>, vector<256x128xf32>,
    } else {
    }
    %c0 = arith.constant 0 : index
    %c0_1 = arith.constant 0 : index
    %3 = vector.load %arg10[%c0, %c0_1] : memref<256x128xf32, #tpu.memory_space<vmem>>, vector<256x128xf32>
    %c0_2 = arith.constant 0 : index
    %c0_3 = arith.constant 0 : index
    %4 = vector.load %arg2[%c0_2, %c0_3] : memref<256x256xi8, #tpu.memory_space<vmem>>, vector<256x256xi8>
    %5 = arith.sitofp %4 : vector<256x256xi8> to vector<256x256xbf16>
    %c0_4 = arith.constant 0 : index
    %c0_5 = arith.constant 0 : index
    %6 = vector.load %arg3[%c0_4, %c0_5] : memref<256x128xbf16, #tpu.memory_space<vmem>>, vector<256x128xbf16>
    %cst = arith.constant dense<0.000000e+00> : vector<256x128xf32>
    %7 = tpu.matmul %5, %6, %cst {dimension_numbers = #tpu.dot_dimension_numbers<[1], [0], [0], [1], [0, 0, 1, 1], [], []>} : vector<256x256xbf16>, vector<256x128xbf16>, vector<256x128xf32> -> vector<256x128xf32>
    %8 = arith.addf %3, %7 : vector<256x128xf32>
    %c0_6 = arith.constant 0 : index
    %c0_7 = arith.constant 0 : index
    %9 = vector.load %arg10[%c0_6, %c0_7] : memref<256x128xf32, #tpu.memory_space<vmem>>, vector<256x128xf32>
    tpu.vector_store %arg10[%c0_6, %c0_7], %8 {strides = array<i32>} : memref<256x128xf32, #tpu.memory_space<vmem>>, vector<256x128xf32>,
    %c0_i32_8 = arith.constant 0 : i32
    %10 = arith.cmpi eq, %arg1, %c0_i32_8 : i32
    %11 = arith.extui %10 : i1 to i32
    %c0_i32_9 = arith.constant 0 : i32
    %12 = arith.cmpi ne, %11, %c0_i32_9 : i32
    scf.if %12 {
      %c0_10 = arith.constant 0 : index
      %c0_11 = arith.constant 0 : index
      %13 = vector.load %arg10[%c0_10, %c0_11] : memref<256x128xf32, #tpu.memory_space<vmem>>, vector<256x128xf32>
      %c0_12 = arith.constant 0 : index
      %c0_13 = arith.constant 0 : index
      %14 = vector.load %arg5[%c0_12, %c0_13] : memref<256x1xf32, #tpu.memory_space<vmem>>, vector<256x1xf32>
      %15 = vector.broadcast %14 : vector<256x1xf32> to vector<256x128xf32>
      %16 = arith.mulf %13, %15 : vector<256x128xf32>
      %17 = arith.truncf %16 : vector<256x128xf32> to vector<256x128xbf16>
      %c0_14 = arith.constant 0 : index
      %c0_15 = arith.constant 0 : index
      %18 = vector.load %arg4[%c0_14, %c0_15] : memref<256x128xbf16, #tpu.memory_space<vmem>>, vector<256x128xbf16>
      %c0_16 = arith.constant 0 : index
      %c0_17 = arith.constant 0 : index
      %19 = vector.load %arg6[%c0_16, %c0_17] : memref<128x128xbf16, #tpu.memory_space<vmem>>, vector<128x128xbf16>
      %cst_18 = arith.constant dense<0.000000e+00> : vector<256x128xf32>
      %20 = tpu.matmul %18, %19, %cst_18 {dimension_numbers = #tpu.dot_dimension_numbers<[1], [0], [0], [1], [0, 0, 1, 1], [], []>} : vector<256x128xbf16>, vector<128x128xbf16>, vector<256x128xf32> -> vector<256x128xf32>
      %c0_19 = arith.constant 0 : index
      %c0_20 = arith.constant 0 : index
      %21 = vector.load %arg7[%c0_19, %c0_20] : memref<128x128xbf16, #tpu.memory_space<vmem>>, vector<128x128xbf16>
      %cst_21 = arith.constant dense<0.000000e+00> : vector<256x128xf32>
      %22 = tpu.matmul %17, %21, %cst_21 {dimension_numbers = #tpu.dot_dimension_numbers<[1], [0], [0], [1], [0, 0, 1, 1], [], []>} : vector<256x128xbf16>, vector<128x128xbf16>, vector<256x128xf32> -> vector<256x128xf32>
      %23 = arith.addf %20, %22 : vector<256x128xf32>
      %c0_22 = arith.constant 0 : index
      %c0_23 = arith.constant 0 : index
      %24 = vector.load %arg8[%c0_22, %c0_23] : memref<1x128xf32, #tpu.memory_space<vmem>>, vector<1x128xf32>
      %25 = vector.broadcast %24 : vector<1x128xf32> to vector<256x128xf32>
      %26 = arith.addf %23, %25 : vector<256x128xf32>
      %cst_24 = arith.constant 0.000000e+00 : f32
      %27 = vector.broadcast %cst_24 : f32 to vector<256x128xf32>
      %28 = arith.maximumf %26, %27 : vector<256x128xf32>
      %29 = arith.truncf %28 : vector<256x128xf32> to vector<256x128xbf16>
      %c0_25 = arith.constant 0 : index
      %c0_26 = arith.constant 0 : index
      %30 = vector.load %arg9[%c0_25, %c0_26] : memref<256x128xbf16, #tpu.memory_space<vmem>>, vector<256x128xbf16>
      tpu.vector_store %arg9[%c0_25, %c0_26], %29 {strides = array<i32>} : memref<256x128xbf16, #tpu.memory_space<vmem>>, vector<256x128xbf16>,
    } else {
    }
    return
  }
  func.func @transform_0(%arg0: i32, %arg1: i32) -> (i32, i32) {
    %c0_i32 = arith.constant 0 : i32
    return %arg0, %arg1 : i32, i32
  }
  func.func @transform_1(%arg0: i32, %arg1: i32) -> (i32, i32) {
    %c0_i32 = arith.constant 0 : i32
    %c0_i32_0 = arith.constant 0 : i32
    return %arg1, %c0_i32 : i32, i32
  }
  func.func @transform_2(%arg0: i32, %arg1: i32) -> (i32, i32) {
    %c0_i32 = arith.constant 0 : i32
    %c0_i32_0 = arith.constant 0 : i32
    return %arg0, %c0_i32 : i32, i32
  }
  func.func @transform_3(%arg0: i32, %arg1: i32) -> (i32, i32) {
    %c0_i32 = arith.constant 0 : i32
    %c0_i32_0 = arith.constant 0 : i32
    return %arg0, %c0_i32 : i32, i32
  }
  func.func @transform_4(%arg0: i32, %arg1: i32) -> (i32, i32) {
    %c0_i32 = arith.constant 0 : i32
    %c0_i32_0 = arith.constant 0 : i32
    %c0_i32_1 = arith.constant 0 : i32
    return %c0_i32, %c0_i32_0 : i32, i32
  }
  func.func @transform_5(%arg0: i32, %arg1: i32) -> (i32, i32) {
    %c0_i32 = arith.constant 0 : i32
    %c0_i32_0 = arith.constant 0 : i32
    %c0_i32_1 = arith.constant 0 : i32
    return %c0_i32, %c0_i32_0 : i32, i32
  }
  func.func @transform_6(%arg0: i32, %arg1: i32) -> (i32, i32) {
    %c0_i32 = arith.constant 0 : i32
    %c0_i32_0 = arith.constant 0 : i32
    %c0_i32_1 = arith.constant 0 : i32
    return %c0_i32, %c0_i32_0 : i32, i32
  }
  func.func @transform_7(%arg0: i32, %arg1: i32) -> (i32, i32) {
    %c0_i32 = arith.constant 0 : i32
    %c0_i32_0 = arith.constant 0 : i32
    return %arg0, %c0_i32 : i32, i32
  }
}

</mosaic_0001>

<bundles_post_ra>
// kernel: tpu_custom_call.1
= control target key start
LH: loop header
LB: loop body
LE: loop exit
PB: predicated region body
PF: predicated region fallthrough
CT: control target
= control target key end

     0   :  { %12 = vsyncpa [#allocation4], 0  ;;  %s2616_s0 = inlined_call_operand.vmem [shape: s8[256,256], index: 0, kind: input, shape index: {}]   ;;  %s2617_s1 = inlined_call_operand.vmem [shape: bf16[256,128], index: 1, kind: input, shape index: {}]   ;;  %s2618_s2 = inlined_call_operand.hbm [shape: bf16[256,128], index: 2, kind: input, shape index: {}]   ;;  %s2619_s3 = inlined_call_operand.vmem [shape: f32[256,1], index: 3, kind: input, shape index: {}]   ;;  %s2620_s4 = inlined_call_operand.hbm [shape: bf16[128,128], index: 4, kind: input, shape index: {}]   ;;  %s2621_s5 = inlined_call_operand.hbm [shape: bf16[128,128], index: 5, kind: input, shape index: {}]   ;;  %s2622_s6 = inlined_call_operand.vmem [shape: f32[1,128], index: 6, kind: input, shape index: {}]   ;;  %s2623_s7 = inlined_call_operand.hbm [shape: bf16[256,128], index: 7, kind: output, shape index: {}]  }
   0x1   :  { %13 = vsyncpa [#allocation7], 0 }
   0x2   :  { %14 = vsyncpa [#allocation5], 0  ;;  %s2247_s24 = smov [#allocation6]   ;;  %s2248_s26 = smov [#allocation3]  }
   0x3   :  { %s38_s25 = sshll.u32 %s2247_s24, 4  ;;  %s24_s27 = sshll.u32 %s2248_s26, 4  ;;  %s39_s25 = int_to_ptr.vmem [resolvable:$true] %s38_s25  ;;  %s25_s27 = int_to_ptr.vmem [resolvable:$true] %s24_s27 }
   0x4   :  { %s2169_s28 = scalar_lea.vmem %s39_s25, 1024  ;;  %p2174_p1 = scmp.lt.s32.totalorder %s39_s25, %s39_s25 }
   0x5   :  { %p2170_p0 = scmp.ne.s32.totalorder %s39_s25, %s2169_s28  ;;  %p2175_p2 = scmp.lt.s32.totalorder %s2169_s28, %s2169_s28 }
   0x7   :  { %p2176_p3 = por %p2175_p2, %p2174_p1 }
   0x9   :  { %p2177_p4 = pnand %p2176_p3, %p2170_p0 }
   0xb   :  { %2180 = shalt.err (!%p2177_p4)
}
   0xc   :  { %s2249_s29 = smov 64   ;;  %s2250_s30 = smov 4  }
   0xd   :  { %44 = dma.hbm_to_vmem [thread:$0]  %s2620_s4, 1024, %s39_s25, [#allocation7], %s2249_s29, %s2249_s29, %s2250_s30  }
   0xe   :  { %s2189_s10 = scalar_lea.vmem %s25_s27, 2048  ;;  %p2194_p6 = scmp.lt.s32.totalorder %s25_s27, %s25_s27 }
   0xf   :  { %p2190_p5 = scmp.ne.s32.totalorder %s25_s27, %s2189_s10  ;;  %p2195_p7 = scmp.lt.s32.totalorder %s2189_s10, %s2189_s10 }
  0x11   :  { %p2196_p8 = por %p2195_p7, %p2194_p6 }
  0x13   :  { %p2197_p9 = pnand %p2196_p8, %p2190_p5 }
  0x15   :  { %2200 = shalt.err (!%p2197_p9)
}
  0x16   :  { %30 = dma.hbm_to_vmem [thread:$0]  %s2618_s2, 2048, %s25_s27, [#allocation4], %s2249_s29, %s2249_s29, %s2250_s30  }
  0x17   :  { %s2251_s13 = smov [#allocation8]  }
  0x18   :  { %s50_s14 = sshll.u32 %s2251_s13, 4  ;;  %s51_s14 = int_to_ptr.vmem [resolvable:$true] %s50_s14 }
  0x19   :  { %s2209_s15 = scalar_lea.vmem %s51_s14, 1024  ;;  %p2214_p11 = scmp.lt.s32.totalorder %s51_s14, %s51_s14 }
  0x1a   :  { %p2210_p10 = scmp.ne.s32.totalorder %s51_s14, %s2209_s15  ;;  %p2215_p12 = scmp.lt.s32.totalorder %s2209_s15, %s2209_s15 }
  0x1c   :  { %p2216_p13 = por %p2215_p12, %p2214_p11 }
  0x1e   :  { %p2217_p0 = pnand %p2216_p13, %p2210_p10 }
  0x20   :  { %2220 = shalt.err (!%p2217_p0)
}
  0x21   :  { %56 = dma.hbm_to_vmem [thread:$0]  %s2621_s5, 1024, %s51_s14, [#allocation7], %s2249_s29, %s2249_s29, %s2250_s30  }
  0x22   :  { %2241 = dma.done.wait [#allocation4], 2048  }
  0x23   :  { %2242 = vsyncadd [#allocation4], 4294965248 }
  0x24   :  { %2243 = dma.done.wait [#allocation7], 2048  }
  0x25   :  { %2244 = vsyncadd [#allocation7], 4294965248  ;;  %v2252_v0 = vmov 0   ;;  %v2113_v1 = vld [vmem:[%s2617_s1 + $0x78] sm:$0xff]   ;;  %v2115_v3 = vld [vmem:[%s2617_s1 + $0x70] sm:$0xff]  }
  0x26   :  { %2111 = vset.pattern.permute.xlu0 %v2252_v0  ;;  %2112 = vset.pattern.permute.xlu1 %v2252_v0  ;;  %v2114_v2 = vld [vmem:[%s2617_s1 + $0x38] sm:$0xff]   ;;  %v2116_v4 = vld [vmem:[%s2617_s1 + $0x30] sm:$0xff]   ;;  %v2117_v5 = vld [vmem:[%s2617_s1 + $0x68] sm:$0xff]  }
  0x27   :  { %1848 = vmatprep.subr.bf16.mxu0 %v2113_v1  ;;  %v2118_v6 = vld [vmem:[%s2617_s1 + $0x28] sm:$0xff]   ;;  %v2119_v7 = vld [vmem:[%s2617_s1 + $0x60] sm:$0xff]   ;;  %v2121_v9 = vld [vmem:[%s2617_s1 + $0x58] sm:$0xff]  }
  0x28   :  { %1849 = vmatpush3.bf16.msra.mxu0 %v2114_v2  ;;  %v2120_v8 = vld [vmem:[%s2617_s1 + $0x20] sm:$0xff]   ;;  %v2122_v10 = vld [vmem:[%s2617_s1 + $0x18] sm:$0xff]   ;;  %v2123_v11 = vld [vmem:[%s2617_s1 + $0x50] sm:$0xff]  }
  0x29   :  { %1850 = vmatprep.subr.bf16.mxu0 %v2115_v3  ;;  %v138_v12 = vld [vmem:[%s2616_s0 + $0x8] sm:$0xff]  ;;  %v2124_v14 = vld [vmem:[%s2617_s1 + $0x10] sm:$0xff]   ;;  %v573_v15 = vld [vmem:[%s2619_s3] sm:$0xff] }
  0x2a   :  { %v154_v13 = vunpack.c.l.s8.bf16 %v138_v12  ;;  %v575_v16 = vld [vmem:[%s2619_s3 + $0x10] sm:$0xff]  ;;  %v2125_v17 = vld [vmem:[%s2617_s1 + $0x48] sm:$0xff]   ;;  %607 = vperm.xlu0 %2111, %v573_v15   ;;  %v576_v19 = vld [vmem:[%s2619_s3 + $0x18] sm:$0xff]  ;;  %v156_v29 = vunpack.c.h.s8.bf16 %v138_v12 }
  0x2b   :  { %617 = vperm.xlu1 %2112, %v575_v16   ;;  %v574_v18 = vld [vmem:[%s2619_s3 + $0x8] sm:$0xff]  ;;  %v2127_v21 = vld [vmem:[%s2617_s1 + $0x40] sm:$0xff]   ;;  %v579_v26 = vld [vmem:[%s2619_s3 + $0x30] sm:$0xff] }
  0x2c   :  { %1851 = vmatpush3.bf16.msra.mxu0 %v2116_v4  ;;  %345 = vmatprep.mubr.bf16.mxu0 %v154_v13  ;;  %v2126_v20 = vld [vmem:[%s2617_s1 + $0x8] sm:$0xff]   ;;  %v577_v22 = vld [vmem:[%s2619_s3 + $0x20] sm:$0xff]  ;;  %v580_v28 = vld [vmem:[%s2619_s3 + $0x38] sm:$0xff] }
  0x2d   :  { %1852 = vmatprep.subr.bf16.mxu0 %v2117_v5  ;;  %v578_v23 = vld [vmem:[%s2619_s3 + $0x28] sm:$0xff]  ;;  %v2128_v24 = vld [vmem:[%s2617_s1] sm:$0xff]   ;;  %v2129_v32 = vld [vmem:[#allocation8 + $0x38] sm:$0xff]  }
  0x2e   :  { %612 = vperm.xlu0 %2111, %v574_v18   ;;  %v137_v25 = vld [vmem:[%s2616_s0] sm:$0xff]  ;;  %v582_v31 = vld [vmem:[%s2619_s3 + $0x48] sm:$0xff]  ;;  %v2130_v33 = vld [vmem:[#allocation8 + $0x30] sm:$0xff]   ;;  %2008 = vmatprep.subr.bf16.mxu1 %v2129_v32 }
  0x2f   :  { %622 = vperm.xlu1 %2112, %v576_v19   ;;  %v153_v27 = vunpack.c.l.s8.bf16 %v137_v25  ;;  %v581_v30 = vld [vmem:[%s2619_s3 + $0x40] sm:$0xff]  ;;  %v140_v34 = vld [vmem:[%s2616_s0 + $0x18] sm:$0xff]  ;;  %v2131_v35 = vld [vmem:[#allocation8 + $0x28] sm:$0xff]   ;;  %2009 = vmatpush3.bf16.msra.mxu1 %v2129_v32  ;;  %v155_v38 = vunpack.c.h.s8.bf16 %v137_v25 }
  0x30   :  { %1853 = vmatpush3.bf16.msra.mxu0 %v2118_v6  ;;  %v583_v36 = vld [vmem:[%s2619_s3 + $0x50] sm:$0xff]  ;;  %v584_v37 = vld [vmem:[%s2619_s3 + $0x58] sm:$0xff]  ;;  %2010 = vmatprep.subr.bf16.mxu1 %v2130_v33  ;;  %v158_v39 = vunpack.c.l.s8.bf16 %v140_v34  ;;  %v585_v40 = vld [vmem:[%s2619_s3 + $0x60] sm:$0xff]  ;;  %v160_v46 = vunpack.c.h.s8.bf16 %v140_v34 }
  0x31   :  { %1854 = vmatprep.subr.bf16.mxu0 %v2119_v7  ;;  %v586_v41 = vld [vmem:[%s2619_s3 + $0x68] sm:$0xff]  ;;  %v139_v42 = vld [vmem:[%s2616_s0 + $0x10] sm:$0xff]  ;;  %v588_v44 = vld [vmem:[%s2619_s3 + $0x78] sm:$0xff] }
  0x32   :  { %627 = vperm.xlu0 %2111, %v577_v22   ;;  %v587_v43 = vld [vmem:[%s2619_s3 + $0x70] sm:$0xff]  ;;  %v157_v45 = vunpack.c.l.s8.bf16 %v139_v42  ;;  %v589_v47 = vld [vmem:[%s2619_s3 + $0x80] sm:$0xff]  ;;  %v590_v48 = vld [vmem:[%s2619_s3 + $0x88] sm:$0xff]  ;;  %v159_v51 = vunpack.c.h.s8.bf16 %v139_v42 }
  0x33   :  { %632 = vperm.xlu1 %2112, %v578_v23   ;;  %2011 = vmatpush3.bf16.msra.mxu1 %v2130_v33  ;;  %v142_v49 = vld [vmem:[%s2616_s0 + $0x28] sm:$0xff]  ;;  %v591_v50 = vld [vmem:[%s2619_s3 + $0x90] sm:$0xff]  ;;  %v592_v52 = vld [vmem:[%s2619_s3 + $0x98] sm:$0xff] }
  0x34   :  { %1855 = vmatpush3.bf16.msra.mxu0 %v2120_v8  ;;  %2012 = vmatprep.subr.bf16.mxu1 %v2131_v35  ;;  %v162_v53 = vunpack.c.l.s8.bf16 %v142_v49  ;;  %v593_v54 = vld [vmem:[%s2619_s3 + $0xa0] sm:$0xff]  ;;  %v594_v55 = vld [vmem:[%s2619_s3 + $0xa8] sm:$0xff]  ;;  %v595_v57 = vld [vmem:[%s2619_s3 + $0xb0] sm:$0xff]  ;;  %v164_v60 = vunpack.c.h.s8.bf16 %v142_v49 }
  0x35   :  { %1856 = vmatprep.subr.bf16.mxu0 %v2121_v9  ;;  %v141_v56 = vld [vmem:[%s2616_s0 + $0x20] sm:$0xff]  ;;  %v596_v59 = vld [vmem:[%s2619_s3 + $0xb8] sm:$0xff]  ;;  %v598_v62 = vld [vmem:[%s2619_s3 + $0xc8] sm:$0xff] }
  0x36   :  { %637 = vperm.xlu0 %2111, %v579_v26   ;;  %v161_v58 = vunpack.c.l.s8.bf16 %v141_v56  ;;  %v597_v61 = vld [vmem:[%s2619_s3 + $0xc0] sm:$0xff]  ;;  %v144_v63 = vld [vmem:[%s2616_s0 + $0x38] sm:$0xff]  ;;  %v599_v0 = vld [vmem:[%s2619_s3 + $0xd0] sm:$0xff]  ;;  %v163_v1 = vunpack.c.h.s8.bf16 %v141_v56 }
  0x37   :  { %642 = vperm.xlu1 %2112, %v580_v28   ;;  %2013 = vmatpush3.bf16.msra.mxu1 %v2131_v35  ;;  %v600_v2 = vld [vmem:[%s2619_s3 + $0xd8] sm:$0xff]  ;;  %v166_v3 = vunpack.c.l.s8.bf16 %v144_v63  ;;  %v601_v4 = vld [vmem:[%s2619_s3 + $0xe0] sm:$0xff]  ;;  %v602_v5 = vld [vmem:[%s2619_s3 + $0xe8] sm:$0xff] }
  0x38   :  { %1857 = vmatpush3.bf16.msra.mxu0 %v2122_v10  ;;  %v143_v6 = vld [vmem:[%s2616_s0 + $0x30] sm:$0xff]  ;;  %v604_v9 = vld [vmem:[%s2619_s3 + $0xf8] sm:$0xff]  ;;  %v168_v10 = vunpack.c.h.s8.bf16 %v144_v63  ;;  %v150_v28 = vld [vmem:[%s2616_s0 + $0x68] sm:$0xff] }
  0x39   :  { %1858 = vmatprep.subr.bf16.mxu0 %v2123_v11  ;;  %v603_v7 = vld [vmem:[%s2619_s3 + $0xf0] sm:$0xff]  ;;  %v165_v8 = vunpack.c.l.s8.bf16 %v143_v6  ;;  %v146_v11 = vld [vmem:[%s2616_s0 + $0x48] sm:$0xff]  ;;  %v167_v12 = vunpack.c.h.s8.bf16 %v143_v6  ;;  %v148_v18 = vld [vmem:[%s2616_s0 + $0x58] sm:$0xff]  ;;  %v180_v33 = vunpack.c.h.s8.bf16 %v150_v28 }
  0x3a   :  { %647 = vperm.xlu0 %2111, %v581_v30   ;;  %v170_v13 = vunpack.c.l.s8.bf16 %v146_v11  ;;  %v172_v16 = vunpack.c.h.s8.bf16 %v146_v11  ;;  %v2133_v19 = vld [vmem:[#allocation8 + $0x18] sm:$0xff]   ;;  %v2134_v22 = vld [vmem:[#allocation8 + $0x10] sm:$0xff]   ;;  %v176_v26 = vunpack.c.h.s8.bf16 %v148_v18  ;;  %v178_v30 = vunpack.c.l.s8.bf16 %v150_v28 }
  0x3b   :  { %652 = vperm.xlu1 %2112, %v582_v31   ;;  %v147_v23 = vld [vmem:[%s2616_s0 + $0x50] sm:$0xff]  ;;  %v149_v31 = vld [vmem:[%s2616_s0 + $0x60] sm:$0xff]  ;;  %v152_v34 = vld [vmem:[%s2616_s0 + $0x78] sm:$0xff] }
  0x3c   :  { %1859 = vmatpush3.bf16.msra.mxu0 %v2124_v14  ;;  %v145_v14 = vld [vmem:[%s2616_s0 + $0x40] sm:$0xff]  ;;  %v173_v25 = vunpack.c.l.s8.bf16 %v147_v23  ;;  %v177_v32 = vunpack.c.l.s8.bf16 %v149_v31  ;;  %v179_v35 = vunpack.c.h.s8.bf16 %v149_v31  ;;  %v2142_v28 = vld [vmem:[#allocation6 + $0x10] sm:$0xff]  }
  0x3d   :  { %1860 = vmatprep.subr.bf16.mxu0 %v2125_v17  ;;  %v169_v15 = vunpack.c.l.s8.bf16 %v145_v14  ;;  %v2132_v17 = vld [vmem:[#allocation8 + $0x20] sm:$0xff]  }
  0x3e   :  { %657 = vperm.xlu0 %2111, %v583_v36   ;;  %2014 = vmatprep.subr.bf16.mxu1 %v2132_v17  ;;  %v182_v36 = vunpack.c.l.s8.bf16 %v152_v34 }
  0x3f   :  { %662 = vperm.xlu1 %2112, %v584_v37   ;;  %2015 = vmatpush3.bf16.msra.mxu1 %v2132_v17  ;;  %v151_v37 = vld [vmem:[%s2616_s0 + $0x70] sm:$0xff] }
  0x40   :  { %1861 = vmatpush3.bf16.msra.mxu0 %v2126_v20  ;;  %v171_v20 = vunpack.c.h.s8.bf16 %v145_v14  ;;  %2016 = vmatprep.subr.bf16.mxu1 %v2133_v19 }
  0x41   :  { %1862 = vmatprep.subr.bf16.mxu0 %v2127_v21  ;;  %v174_v21 = vunpack.c.l.s8.bf16 %v148_v18 }
  0x42   :  { %667 = vperm.xlu0 %2111, %v585_v40   ;;  %v183_v40 = vunpack.c.h.s8.bf16 %v151_v37 }
  0x43   :  { %672 = vperm.xlu1 %2112, %v586_v41   ;;  %2017 = vmatpush3.bf16.msra.mxu1 %v2133_v19  ;;  %v2137_v41 = vld [vmem:[#allocation6 + $0x38] sm:$0xff]  }
  0x44   :  { %1863 = vmatpush3.bf16.msra.mxu0 %v2128_v24  ;;  %2018 = vmatprep.subr.bf16.mxu1 %v2134_v22  ;;  %v2135_v24 = vld [vmem:[#allocation8 + $0x8] sm:$0xff]  }
  0x46   :  { %677 = vperm.xlu0 %2111, %v587_v43  }
  0x47   :  { %346 = vmatmul.mubr.bf16.vlgmr.msra.gmra.mxu0 %v153_v27  ;;  %682 = vperm.xlu1 %2112, %v588_v44   ;;  %v2136_v27 = vld [vmem:[#allocation8] sm:$0xff]  }
  0x48   :  { %353 = vmatprep.mubr.bf16.mxu0 %v156_v29  ;;  %2019 = vmatpush3.bf16.msra.mxu1 %v2134_v22  ;;  %v175_v29 = vunpack.c.h.s8.bf16 %v147_v23 }
  0x49   :  { %2020 = vmatprep.subr.bf16.mxu1 %v2135_v24 }
  0x4a   :  { %687 = vperm.xlu0 %2111, %v589_v47  }
  0x4b   :  { %692 = vperm.xlu1 %2112, %v590_v48  }
  0x4c   :  { %2021 = vmatpush3.bf16.msra.mxu1 %v2135_v24 }
  0x4d   :  { %2022 = vmatprep.subr.bf16.mxu1 %v2136_v27 }
  0x4e   :  { %697 = vperm.xlu0 %2111, %v591_v50  }
  0x4f   :  { %354 = vmatmul.mubr.bf16.gmra.mxu0 %v155_v38  ;;  %702 = vperm.xlu1 %2112, %v592_v52   ;;  %v181_v38 = vunpack.c.l.s8.bf16 %v151_v37 }
  0x50   :  { %361 = vmatprep.mubr.bf16.mxu0 %v158_v39  ;;  %2023 = vmatpush3.bf16.msra.mxu1 %v2136_v27  ;;  %v184_v39 = vunpack.c.h.s8.bf16 %v152_v34  ;;  %v2143_v34 = vld [vmem:[#allocation6 + $0x8] sm:$0xff]  }
  0x51   :  { %2056 = vmatprep.subr.bf16.mxu1 %v2137_v41 }
  0x52   :  { %707 = vperm.xlu0 %2111, %v593_v54  }
  0x53   :  { %712 = vperm.xlu1 %2112, %v594_v55  }
  0x56   :  { %717 = vperm.xlu0 %2111, %v595_v57  }
  0x57   :  { %362 = vmatmul.mubr.bf16.gmra.mxu0 %v157_v45  ;;  %722 = vperm.xlu1 %2112, %v596_v59  }
  0x58   :  { %369 = vmatprep.mubr.bf16.mxu0 %v160_v46 }
  0x5a   :  { %727 = vperm.xlu0 %2111, %v597_v61  }
  0x5b   :  { %732 = vperm.xlu1 %2112, %v598_v62  }
  0x5e   :  { %737 = vperm.xlu0 %2111, %v599_v0  }
  0x5f   :  { %370 = vmatmul.mubr.bf16.gmra.mxu0 %v159_v51  ;;  %742 = vperm.xlu1 %2112, %v600_v2   ;;  %v2138_v2 = vld [vmem:[#allocation6 + $0x30] sm:$0xff]  }
  0x60   :  { %377 = vmatprep.mubr.bf16.mxu0 %v162_v53 }
  0x62   :  { %747 = vperm.xlu0 %2111, %v601_v4  }
  0x63   :  { %752 = vperm.xlu1 %2112, %v602_v5  }
  0x66   :  { %757 = vperm.xlu0 %2111, %v603_v7  }
  0x67   :  { %378 = vmatmul.mubr.bf16.gmra.mxu0 %v161_v58  ;;  %762 = vperm.xlu1 %2112, %v604_v9  }
  0x68   :  { %385 = vmatprep.mubr.bf16.mxu0 %v164_v60 }
  0x6f   :  { %386 = vmatmul.mubr.bf16.gmra.mxu0 %v163_v1 }
  0x70   :  { %393 = vmatprep.mubr.bf16.mxu0 %v166_v3 }
  0x77   :  { %394 = vmatmul.mubr.bf16.gmra.mxu0 %v165_v8  ;;  %v2139_v8 = vld [vmem:[#allocation6 + $0x28] sm:$0xff]  }
  0x78   :  { %401 = vmatprep.mubr.bf16.mxu0 %v168_v10 }
  0x7f   :  { %402 = vmatmul.mubr.bf16.gmra.mxu0 %v167_v12 }
  0x80   :  { %409 = vmatprep.mubr.bf16.mxu0 %v170_v13 }
  0x87   :  { %410 = vmatmul.mubr.bf16.gmra.mxu0 %v169_v15  ;;  %v2140_v15 = vld [vmem:[#allocation6 + $0x20] sm:$0xff]  }
  0x88   :  { %417 = vmatprep.mubr.bf16.mxu0 %v172_v16 }
  0x8f   :  { %418 = vmatmul.mubr.bf16.gmra.mxu0 %v171_v20 }
  0x90   :  { %425 = vmatprep.mubr.bf16.mxu0 %v174_v21  ;;  %v2141_v21 = vld [vmem:[#allocation6 + $0x18] sm:$0xff]  }
  0x97   :  { %426 = vmatmul.mubr.bf16.gmra.mxu0 %v173_v25 }
  0x98   :  { %433 = vmatprep.mubr.bf16.mxu0 %v176_v26 }
  0x9f   :  { %434 = vmatmul.mubr.bf16.gmra.mxu0 %v175_v29 }
  0xa0   :  { %441 = vmatprep.mubr.bf16.mxu0 %v178_v30 }
  0xa5   :  { %v608_v43 = vpop.permute.xlu0 %607 }
  0xa6   :  { %v618_v53 = vpop.permute.xlu1 %617 }
  0xa7   :  { %442 = vmatmul.mubr.bf16.gmra.mxu0 %v177_v32 }
  0xa8   :  { %449 = vmatprep.mubr.bf16.mxu0 %v180_v33 }
  0xa9   :  { %v613_v48 = vpop.permute.xlu0 %612 }
  0xaa   :  { %v623_v60 = vpop.permute.xlu1 %622 }
  0xad   :  { %v628_v6 = vpop.permute.xlu0 %627 }
  0xae   :  { %v633_v9 = vpop.permute.xlu1 %632 }
  0xaf   :  { %450 = vmatmul.mubr.bf16.gmra.mxu0 %v179_v35 }
  0xb0   :  { %457 = vmatprep.mubr.bf16.mxu0 %v182_v36 }
  0xb1   :  { %v638_v19 = vpop.permute.xlu0 %637 }
  0xb2   :  { %v643_v22 = vpop.permute.xlu1 %642 }
  0xb5   :  { %v648_v32 = vpop.permute.xlu0 %647 }
  0xb6   :  { %v653_v35 = vpop.permute.xlu1 %652 }
  0xb7   :  { %458 = vmatmul.mubr.bf16.gmra.mxu0 %v181_v38 }
  0xb8   :  { %465 = vmatprep.mubr.bf16.mxu0 %v184_v39 }
  0xbf   :  { %466 = vmatmul.mubr.bf16.gmra.mxu0 %v183_v40 }
 0x107   :  { %v1864_v42 = vpop.f32.mrf.mxu0 }
 0x109   :  { %v1865_v44 = vpop.f32.mrf.mxu0 }
 0x10a   :  { %v1866_v46 = vadd.f32 %v1865_v44, %v1864_v42 }
 0x10b   :  { %v1867_v45 = vpop.f32.mrf.mxu0 }
 0x10c   :  { %v765_v51 = vmul.f32 %v1866_v46, %v608_v43 }
 0x10d   :  { %v1868_v47 = vpop.f32.mrf.mxu0 }
 0x10e   :  { %v1869_v49 = vadd.f32 %v1868_v47, %v1867_v45  ;;  %v658_v45 = vpop.permute.xlu0 %657  ;;  %v663_v47 = vpop.permute.xlu1 %662 }
 0x10f   :  { %v1870_v50 = vpop.f32.mrf.mxu0 }
 0x110   :  { %v766_v52 = vmul.f32 %v1869_v49, %v613_v48 }
 0x111   :  { %v1871_v54 = vpop.f32.mrf.mxu0 }
 0x112   :  { %v797_v55 = vpack.c.bf16 %v766_v52, %v765_v51  ;;  %v1872_v57 = vadd.f32 %v1871_v54, %v1870_v50 }
 0x113   :  { %v1873_v56 = vpop.f32.mrf.mxu0 }
 0x114   :  { %2024 = vmatprep.mubr.bf16.mxu1 %v797_v55  ;;  %v767_v62 = vmul.f32 %v1872_v57, %v618_v53 }
 0x115   :  { %v1874_v58 = vpop.f32.mrf.mxu0 }
 0x116   :  { %v1875_v59 = vadd.f32 %v1874_v58, %v1873_v56  ;;  %v668_v56 = vpop.permute.xlu0 %667  ;;  %v673_v58 = vpop.permute.xlu1 %672 }
 0x117   :  { %v1876_v61 = vpop.f32.mrf.mxu0 }
 0x118   :  { %v768_v63 = vmul.f32 %v1875_v59, %v623_v60 }
 0x119   :  { %v1877_v0 = vpop.f32.mrf.mxu0 }
 0x11a   :  { %v798_v1 = vpack.c.bf16 %v768_v63, %v767_v62  ;;  %v1878_v4 = vadd.f32 %v1877_v0, %v1876_v61 }
 0x11b   :  { %v1879_v3 = vpop.f32.mrf.mxu0 }
 0x11c   :  { %2025 = vmatmul.mubr.bf16.vlgmr.msra.gmra.mxu1 %v798_v1  ;;  %v769_v11 = vmul.f32 %v1878_v4, %v628_v6 }
 0x11d   :  { %v1880_v5 = vpop.f32.mrf.mxu0  ;;  %2057 = vmatpush3.bf16.msra.mxu1 %v2137_v41  ;;  %v2144_v41 = vld [vmem:[#allocation6] sm:$0xff]  }
 0x11e   :  { %v1881_v7 = vadd.f32 %v1880_v5, %v1879_v3  ;;  %2058 = vmatprep.subr.bf16.mxu1 %v2138_v2  ;;  %v678_v3 = vpop.permute.xlu0 %677  ;;  %v683_v5 = vpop.permute.xlu1 %682 }
 0x11f   :  { %v1882_v10 = vpop.f32.mrf.mxu0 }
 0x120   :  { %v770_v12 = vmul.f32 %v1881_v7, %v633_v9 }
 0x121   :  { %v1883_v13 = vpop.f32.mrf.mxu0  ;;  %2059 = vmatpush3.bf16.msra.mxu1 %v2138_v2 }
 0x122   :  { %v799_v14 = vpack.c.bf16 %v770_v12, %v769_v11  ;;  %2060 = vmatprep.subr.bf16.mxu1 %v2139_v8  ;;  %v1884_v17 = vadd.f32 %v1883_v13, %v1882_v10 }
 0x123   :  { %v1885_v16 = vpop.f32.mrf.mxu0 }
 0x124   :  { %2028 = vmatprep.mubr.bf16.mxu1 %v799_v14  ;;  %v771_v24 = vmul.f32 %v1884_v17, %v638_v19  ;;  %v688_v14 = vpop.permute.xlu0 %687 }
 0x125   :  { %v1886_v18 = vpop.f32.mrf.mxu0  ;;  %2061 = vmatpush3.bf16.msra.mxu1 %v2139_v8 }
 0x126   :  { %v1887_v20 = vadd.f32 %v1886_v18, %v1885_v16  ;;  %2062 = vmatprep.subr.bf16.mxu1 %v2140_v15  ;;  %v693_v16 = vpop.permute.xlu1 %692 }
 0x127   :  { %v1888_v23 = vpop.f32.mrf.mxu0 }
 0x128   :  { %v772_v25 = vmul.f32 %v1887_v20, %v643_v22 }
 0x129   :  { %v1889_v26 = vpop.f32.mrf.mxu0  ;;  %2063 = vmatpush3.bf16.msra.mxu1 %v2140_v15 }
 0x12a   :  { %v800_v27 = vpack.c.bf16 %v772_v25, %v771_v24  ;;  %2064 = vmatprep.subr.bf16.mxu1 %v2141_v21  ;;  %v1890_v30 = vadd.f32 %v1889_v26, %v1888_v23  ;;  %v698_v25 = vpop.permute.xlu0 %697 }
 0x12b   :  { %v1891_v29 = vpop.f32.mrf.mxu0 }
 0x12c   :  { %2029 = vmatmul.mubr.bf16.gmra.mxu1 %v800_v27  ;;  %v773_v37 = vmul.f32 %v1890_v30, %v648_v32  ;;  %v703_v27 = vpop.permute.xlu1 %702 }
 0x12d   :  { %v1892_v31 = vpop.f32.mrf.mxu0  ;;  %2065 = vmatpush3.bf16.msra.mxu1 %v2141_v21 }
 0x12e   :  { %v1893_v33 = vadd.f32 %v1892_v31, %v1891_v29  ;;  %2066 = vmatprep.subr.bf16.mxu1 %v2142_v28 }
 0x12f   :  { %v1894_v36 = vpop.f32.mrf.mxu0 }
 0x130   :  { %v774_v38 = vmul.f32 %v1893_v33, %v653_v35 }
 0x131   :  { %v1895_v39 = vpop.f32.mrf.mxu0  ;;  %2067 = vmatpush3.bf16.msra.mxu1 %v2142_v28 }
 0x132   :  { %v801_v40 = vpack.c.bf16 %v774_v38, %v773_v37  ;;  %2068 = vmatprep.subr.bf16.mxu1 %v2143_v34  ;;  %v1896_v43 = vadd.f32 %v1895_v39, %v1894_v36  ;;  %v708_v36 = vpop.permute.xlu0 %707  ;;  %v713_v38 = vpop.permute.xlu1 %712 }
 0x133   :  { %v1897_v42 = vpop.f32.mrf.mxu0 }
 0x134   :  { %2032 = vmatprep.mubr.bf16.mxu1 %v801_v40  ;;  %v775_v49 = vmul.f32 %v1896_v43, %v658_v45 }
 0x135   :  { %v1898_v44 = vpop.f32.mrf.mxu0  ;;  %2069 = vmatpush3.bf16.msra.mxu1 %v2143_v34 }
 0x136   :  { %v1899_v46 = vadd.f32 %v1898_v44, %v1897_v42  ;;  %2070 = vmatprep.subr.bf16.mxu1 %v2144_v41 }
 0x137   :  { %v1900_v48 = vpop.f32.mrf.mxu0 }
 0x138   :  { %v776_v50 = vmul.f32 %v1899_v46, %v663_v47  ;;  %v718_v47 = vpop.permute.xlu0 %717 }
 0x139   :  { %v1901_v51 = vpop.f32.mrf.mxu0  ;;  %2071 = vmatpush3.bf16.msra.mxu1 %v2144_v41 }
 0x13a   :  { %v802_v52 = vpack.c.bf16 %v776_v50, %v775_v49  ;;  %v1902_v54 = vadd.f32 %v1901_v51, %v1900_v48  ;;  %v723_v49 = vpop.permute.xlu1 %722 }
 0x13b   :  { %v1903_v53 = vpop.f32.mrf.mxu0 }
 0x13c   :  { %2033 = vmatmul.mubr.bf16.gmra.mxu1 %v802_v52  ;;  %v777_v60 = vmul.f32 %v1902_v54, %v668_v56 }
 0x13d   :  { %v1904_v55 = vpop.f32.mrf.mxu0 }
 0x13e   :  { %v1905_v57 = vadd.f32 %v1904_v55, %v1903_v53 }
 0x13f   :  { %v1906_v59 = vpop.f32.mrf.mxu0 }
 0x140   :  { %v778_v61 = vmul.f32 %v1905_v57, %v673_v58  ;;  %v728_v58 = vpop.permute.xlu0 %727 }
 0x141   :  { %v1907_v62 = vpop.f32.mrf.mxu0 }
 0x142   :  { %v803_v63 = vpack.c.bf16 %v778_v61, %v777_v60  ;;  %v1908_v1 = vadd.f32 %v1907_v62, %v1906_v59  ;;  %v733_v60 = vpop.permute.xlu1 %732 }
 0x143   :  { %v1909_v0 = vpop.f32.mrf.mxu0 }
 0x144   :  { %2036 = vmatprep.mubr.bf16.mxu1 %v803_v63  ;;  %v779_v7 = vmul.f32 %v1908_v1, %v678_v3 }
 0x145   :  { %v1910_v2 = vpop.f32.mrf.mxu0 }
 0x146   :  { %v1911_v4 = vadd.f32 %v1910_v2, %v1909_v0 }
 0x147   :  { %v1912_v6 = vpop.f32.mrf.mxu0 }
 0x148   :  { %v780_v8 = vmul.f32 %v1911_v4, %v683_v5  ;;  %v738_v5 = vpop.permute.xlu0 %737 }
 0x149   :  { %v1913_v9 = vpop.f32.mrf.mxu0 }
 0x14a   :  { %v804_v10 = vpack.c.bf16 %v780_v8, %v779_v7  ;;  %v1914_v12 = vadd.f32 %v1913_v9, %v1912_v6  ;;  %v743_v7 = vpop.permute.xlu1 %742 }
 0x14b   :  { %v1915_v11 = vpop.f32.mrf.mxu0 }
 0x14c   :  { %2037 = vmatmul.mubr.bf16.gmra.mxu1 %v804_v10  ;;  %v781_v18 = vmul.f32 %v1914_v12, %v688_v14 }
 0x14d   :  { %v1916_v13 = vpop.f32.mrf.mxu0 }
 0x14e   :  { %v1917_v15 = vadd.f32 %v1916_v13, %v1915_v11 }
 0x14f   :  { %v1918_v17 = vpop.f32.mrf.mxu0 }
 0x150   :  { %v782_v19 = vmul.f32 %v1917_v15, %v693_v16  ;;  %v748_v16 = vpop.permute.xlu0 %747 }
 0x151   :  { %v1919_v20 = vpop.f32.mrf.mxu0 }
 0x152   :  { %v805_v21 = vpack.c.bf16 %v782_v19, %v781_v18  ;;  %v1920_v23 = vadd.f32 %v1919_v20, %v1918_v17  ;;  %v753_v18 = vpop.permute.xlu1 %752 }
 0x153   :  { %v1921_v22 = vpop.f32.mrf.mxu0 }
 0x154   :  { %2040 = vmatprep.mubr.bf16.mxu1 %v805_v21  ;;  %v783_v29 = vmul.f32 %v1920_v23, %v698_v25 }
 0x155   :  { %v1922_v24 = vpop.f32.mrf.mxu0 }
 0x156   :  { %v1923_v26 = vadd.f32 %v1922_v24, %v1921_v22 }
 0x157   :  { %v1924_v28 = vpop.f32.mrf.mxu0 }
 0x158   :  { %v784_v30 = vmul.f32 %v1923_v26, %v703_v27 }
 0x159   :  { %v1925_v31 = vpop.f32.mrf.mxu0 }
 0x15a   :  { %v806_v32 = vpack.c.bf16 %v784_v30, %v783_v29  ;;  %v1926_v34 = vadd.f32 %v1925_v31, %v1924_v28  ;;  %v758_v28 = vpop.permute.xlu0 %757  ;;  %v763_v29 = vpop.permute.xlu1 %762 }
 0x15b   :  { %v1927_v33 = vpop.f32.mrf.mxu0 }
 0x15c   :  { %2041 = vmatmul.mubr.bf16.gmra.mxu1 %v806_v32  ;;  %v785_v40 = vmul.f32 %v1926_v34, %v708_v36  ;;  %v2145_v32 = vld [vmem:[#allocation3] sm:$0xff]   ;;  %v2146_v34 = vld [vmem:[#allocation3 + $0x8] sm:$0xff]   ;;  %v2148_v36 = vld [vmem:[#allocation3 + $0x18] sm:$0xff]  }
 0x15d   :  { %v1928_v35 = vpop.f32.mrf.mxu0 }
 0x15e   :  { %v1929_v37 = vadd.f32 %v1928_v35, %v1927_v33  ;;  %v2147_v35 = vld [vmem:[#allocation3 + $0x10] sm:$0xff]  }
 0x15f   :  { %v1930_v39 = vpop.f32.mrf.mxu0 }
 0x160   :  { %v786_v41 = vmul.f32 %v1929_v37, %v713_v38  ;;  %v2149_v37 = vld [vmem:[#allocation3 + $0x20] sm:$0xff]   ;;  %v2150_v38 = vld [vmem:[#allocation3 + $0x28] sm:$0xff]  }
 0x161   :  { %v1931_v42 = vpop.f32.mrf.mxu0 }
 0x162   :  { %v807_v43 = vpack.c.bf16 %v786_v41, %v785_v40  ;;  %v1932_v45 = vadd.f32 %v1931_v42, %v1930_v39  ;;  %v2151_v39 = vld [vmem:[#allocation3 + $0x30] sm:$0xff]   ;;  %v2152_v40 = vld [vmem:[#allocation3 + $0x38] sm:$0xff]   ;;  %v2153_v41 = vld [vmem:[#allocation3 + $0x40] sm:$0xff]  }
 0x163   :  { %v1933_v44 = vpop.f32.mrf.mxu0  ;;  %v2154_v42 = vld [vmem:[#allocation3 + $0x48] sm:$0xff]  }
 0x164   :  { %2044 = vmatprep.mubr.bf16.mxu1 %v807_v43  ;;  %v787_v51 = vmul.f32 %v1932_v45, %v718_v47  ;;  %v2155_v43 = vld [vmem:[#allocation3 + $0x50] sm:$0xff]   ;;  %v2157_v45 = vld [vmem:[#allocation3 + $0x60] sm:$0xff]  }
 0x165   :  { %v1934_v46 = vpop.f32.mrf.mxu0  ;;  %v2159_v47 = vld [vmem:[#allocation3 + $0x70] sm:$0xff]  }
 0x166   :  { %v1935_v48 = vadd.f32 %v1934_v46, %v1933_v44  ;;  %v2156_v44 = vld [vmem:[#allocation3 + $0x58] sm:$0xff]   ;;  %v2158_v46 = vld [vmem:[#allocation3 + $0x68] sm:$0xff]  }
 0x167   :  { %v1936_v50 = vpop.f32.mrf.mxu0 }
 0x168   :  { %v788_v52 = vmul.f32 %v1935_v48, %v723_v49  ;;  %v2160_v48 = vld [vmem:[#allocation3 + $0x78] sm:$0xff]  }
 0x169   :  { %v1937_v53 = vpop.f32.mrf.mxu0 }
 0x16a   :  { %v808_v54 = vpack.c.bf16 %v788_v52, %v787_v51  ;;  %v1938_v56 = vadd.f32 %v1937_v53, %v1936_v50 }
 0x16b   :  { %v1939_v55 = vpop.f32.mrf.mxu0 }
 0x16c   :  { %2045 = vmatmul.mubr.bf16.gmra.mxu1 %v808_v54  ;;  %v789_v62 = vmul.f32 %v1938_v56, %v728_v58 }
 0x16d   :  { %v1940_v57 = vpop.f32.mrf.mxu0 }
 0x16e   :  { %v1941_v59 = vadd.f32 %v1940_v57, %v1939_v55 }
 0x16f   :  { %v1942_v61 = vpop.f32.mrf.mxu0 }
 0x170   :  { %v790_v63 = vmul.f32 %v1941_v59, %v733_v60 }
 0x171   :  { %v1943_v0 = vpop.f32.mrf.mxu0 }
 0x172   :  { %v809_v1 = vpack.c.bf16 %v790_v63, %v789_v62  ;;  %v1944_v3 = vadd.f32 %v1943_v0, %v1942_v61 }
 0x173   :  { %v1945_v2 = vpop.f32.mrf.mxu0 }
 0x174   :  { %2048 = vmatprep.mubr.bf16.mxu1 %v809_v1  ;;  %v791_v9 = vmul.f32 %v1944_v3, %v738_v5 }
 0x175   :  { %v1946_v4 = vpop.f32.mrf.mxu0 }
 0x176   :  { %v1947_v6 = vadd.f32 %v1946_v4, %v1945_v2 }
 0x177   :  { %v1948_v8 = vpop.f32.mrf.mxu0 }
 0x178   :  { %v792_v10 = vmul.f32 %v1947_v6, %v743_v7 }
 0x179   :  { %v1949_v11 = vpop.f32.mrf.mxu0 }
 0x17a   :  { %v810_v12 = vpack.c.bf16 %v792_v10, %v791_v9  ;;  %v1950_v14 = vadd.f32 %v1949_v11, %v1948_v8 }
 0x17b   :  { %v1951_v13 = vpop.f32.mrf.mxu0 }
 0x17c   :  { %2049 = vmatmul.mubr.bf16.gmra.mxu1 %v810_v12  ;;  %v793_v20 = vmul.f32 %v1950_v14, %v748_v16 }
 0x17d   :  { %v1952_v15 = vpop.f32.mrf.mxu0 }
 0x17e   :  { %v1953_v17 = vadd.f32 %v1952_v15, %v1951_v13 }
 0x17f   :  { %v1954_v19 = vpop.f32.mrf.mxu0 }
 0x180   :  { %v794_v21 = vmul.f32 %v1953_v17, %v753_v18 }
 0x181   :  { %v1955_v22 = vpop.f32.mrf.mxu0 }
 0x182   :  { %v811_v23 = vpack.c.bf16 %v794_v21, %v793_v20  ;;  %v1956_v25 = vadd.f32 %v1955_v22, %v1954_v19  ;;  %v2553_v19 = vld [vmem:[%s2622_s6] ss:$0 sm:$0xff]  ;;  %s2253_s6 = smov [#allocation9]  }
 0x183   :  { %v1957_v24 = vpop.f32.mrf.mxu0  ;;  %s1627_s1 = sshll.u32 %s2253_s6, 4  ;;  %s1628_s1 = int_to_ptr.vmem [resolvable:$true] %s1627_s1 }
 0x184   :  { %2052 = vmatprep.mubr.bf16.mxu1 %v811_v23  ;;  %v795_v30 = vmul.f32 %v1956_v25, %v758_v28  ;;  %s2221_s21 = scalar_lea.vmem %s1628_s1, 2048  ;;  %p2226_p2 = scmp.lt.s32.totalorder %s1628_s1, %s1628_s1 }
 0x185   :  { %v1958_v26 = vpop.f32.mrf.mxu0  ;;  %p2222_p1 = scmp.ne.s32.totalorder %s1628_s1, %s2221_s21  ;;  %p2227_p3 = scmp.lt.s32.totalorder %s2221_s21, %s2221_s21 }
 0x186   :  { %v1959_v27 = vadd.f32 %v1958_v26, %v1957_v24 }
 0x187   :  { %p2228_p4 = por %p2227_p3, %p2226_p2 }
 0x188   :  { %v796_v31 = vmul.f32 %v1959_v27, %v763_v29 }
 0x189   :  { %p2229_p5 = pnand %p2228_p4, %p2222_p1 }
 0x18a   :  { %v812_v33 = vpack.c.bf16 %v796_v31, %v795_v30 }
 0x18c   :  { %2053 = vmatmul.mubr.bf16.gmra.mxu1 %v812_v33 }
 0x18d   :  { %2072 = vmatprep.mubr.bf16.mxu1 %v2145_v32 }
 0x194   :  { %2073 = vmatmul.mubr.bf16.vlgmr.msra.gmra.mxu1 %v2146_v34 }
 0x195   :  { %2076 = vmatprep.mubr.bf16.mxu1 %v2147_v35 }
 0x19c   :  { %2077 = vmatmul.mubr.bf16.gmra.mxu1 %v2148_v36 }
 0x19d   :  { %2080 = vmatprep.mubr.bf16.mxu1 %v2149_v37 }
 0x1a4   :  { %2081 = vmatmul.mubr.bf16.gmra.mxu1 %v2150_v38 }
 0x1a5   :  { %2084 = vmatprep.mubr.bf16.mxu1 %v2151_v39 }
 0x1ac   :  { %2085 = vmatmul.mubr.bf16.gmra.mxu1 %v2152_v40 }
 0x1ad   :  { %2088 = vmatprep.mubr.bf16.mxu1 %v2153_v41 }
 0x1b4   :  { %2089 = vmatmul.mubr.bf16.gmra.mxu1 %v2154_v42 }
 0x1b5   :  { %2092 = vmatprep.mubr.bf16.mxu1 %v2155_v43 }
 0x1bc   :  { %2093 = vmatmul.mubr.bf16.gmra.mxu1 %v2156_v44 }
 0x1bd   :  { %2096 = vmatprep.mubr.bf16.mxu1 %v2157_v45 }
 0x1c4   :  { %2097 = vmatmul.mubr.bf16.gmra.mxu1 %v2158_v46 }
 0x1c5   :  { %2100 = vmatprep.mubr.bf16.mxu1 %v2159_v47 }
 0x1cc   :  { %2101 = vmatmul.mubr.bf16.gmra.mxu1 %v2160_v48 }
 0x1dc   :  { %v2026_v49 = vpop.f32.mrf.mxu1 }
 0x1de   :  { %v959_v50 = vpop.f32.mrf.mxu1 }
 0x1e0   :  { %v2027_v51 = vpop.f32.mrf.mxu1 }
 0x1e2   :  { %v962_v52 = vpop.f32.mrf.mxu1 }
 0x1ec   :  { %v2030_v53 = vpop.f32.mrf.mxu1 }
 0x1ee   :  { %v975_v54 = vpop.f32.mrf.mxu1 }
 0x1f0   :  { %v2031_v55 = vpop.f32.mrf.mxu1 }
 0x1f2   :  { %v978_v56 = vpop.f32.mrf.mxu1 }
 0x1fc   :  { %v2034_v57 = vpop.f32.mrf.mxu1 }
 0x1fe   :  { %v2504_v58 = vpop.f32.mrf.mxu1 }
 0x200   :  { %v2506_v59 = vpop.f32.mrf.mxu1 }
 0x202   :  { %v2508_v60 = vpop.f32.mrf.mxu1 }
 0x20c   :  { %v2510_v61 = vpop.f32.mrf.mxu1 }
 0x20e   :  { %v2512_v62 = vpop.f32.mrf.mxu1 }
 0x210   :  { %v2514_v63 = vpop.f32.mrf.mxu1 }
 0x212   :  { %v2516_v0 = vpop.f32.mrf.mxu1 }
 0x21c   :  { %v2518_v1 = vpop.f32.mrf.mxu1 }
 0x21e   :  { %v2520_v2 = vpop.f32.mrf.mxu1 }
 0x220   :  { %v2522_v3 = vpop.f32.mrf.mxu1 }
 0x222   :  { %v2524_v4 = vpop.f32.mrf.mxu1 }
 0x22c   :  { %v2526_v5 = vpop.f32.mrf.mxu1 }
 0x22e   :  { %v2528_v6 = vpop.f32.mrf.mxu1 }
 0x230   :  { %v2530_v7 = vpop.f32.mrf.mxu1 }
 0x232   :  { %v2532_v8 = vpop.f32.mrf.mxu1 }
 0x23c   :  { %v2534_v9 = vpop.f32.mrf.mxu1 }
 0x23e   :  { %v2536_v10 = vpop.f32.mrf.mxu1 }
 0x240   :  { %v2538_v11 = vpop.f32.mrf.mxu1 }
 0x242   :  { %v2540_v12 = vpop.f32.mrf.mxu1 }
 0x24c   :  { %v2542_v13 = vpop.f32.mrf.mxu1 }
 0x24e   :  { %v2544_v14 = vpop.f32.mrf.mxu1 }
 0x250   :  { %v2546_v15 = vpop.f32.mrf.mxu1 }
 0x252   :  { %v2548_v16 = vpop.f32.mrf.mxu1 }
 0x254   :  { %v2074_v17 = vpop.f32.mrf.mxu1 }
 0x255   :  { %v1273_v18 = vadd.f32 %v2074_v17, %v2026_v49 }
 0x256   :  { %v1264_v20 = vpop.f32.mrf.mxu1 }
 0x257   :  { %v1265_v21 = vadd.f32 %v1264_v20, %v959_v50  ;;  %v1400_v23 = vadd.f32 %v2553_v19, %v1273_v18 }
 0x258   :  { %v2075_v22 = vpop.f32.mrf.mxu1 }
 0x259   :  { %v1276_v24 = vadd.f32 %v2075_v22, %v2027_v51  ;;  %v1398_v26 = vadd.f32 %v2553_v19, %v1265_v21  ;;  %v1432_v30 = vmax.f32 %v1400_v23, 0.0 }
 0x25a   :  { %v1267_v25 = vpop.f32.mrf.mxu1 }
 0x25b   :  { %v1401_v27 = vadd.f32 %v2553_v19, %v1276_v24  ;;  %v1268_v28 = vadd.f32 %v1267_v25, %v962_v52  ;;  %v1430_v35 = vmax.f32 %v1398_v26, 0.0 }
 0x25c   :  { %v2078_v29 = vpop.f32.mrf.mxu1 }
 0x25d   :  { %v1433_v31 = vmax.f32 %v1401_v27, 0.0  ;;  %v1399_v32 = vadd.f32 %v2553_v19, %v1268_v28  ;;  %v1289_v33 = vadd.f32 %v2078_v29, %v2030_v53 }
 0x25e   :  { %v1280_v34 = vpop.f32.mrf.mxu1 }
 0x25f   :  { %v1761_v36 = vpack.c.bf16 %v1433_v31, %v1432_v30  ;;  %v1431_v37 = vmax.f32 %v1399_v32, 0.0  ;;  %v1281_v38 = vadd.f32 %v1280_v34, %v975_v54  ;;  %v1404_v41 = vadd.f32 %v2553_v19, %v1289_v33 }
 0x260   :  { %v2079_v39 = vpop.f32.mrf.mxu1 }
 0x261   :  { %1833 = vst [vmem:[#allocation9 + $0x8] sm:$0xff] %v1761_v36   ;;  %v1756_v40 = vpack.c.bf16 %v1431_v37, %v1430_v35  ;;  %v1292_v42 = vadd.f32 %v2079_v39, %v2031_v55  ;;  %v1402_v44 = vadd.f32 %v2553_v19, %v1281_v38  ;;  %v1436_v48 = vmax.f32 %v1404_v41, 0.0 }
 0x262   :  { %v1283_v43 = vpop.f32.mrf.mxu1 }
 0x263   :  { %1757 = vst [vmem:[#allocation9] sm:$0xff] %v1756_v40   ;;  %v1405_v45 = vadd.f32 %v2553_v19, %v1292_v42  ;;  %v1284_v46 = vadd.f32 %v1283_v43, %v978_v56  ;;  %v1434_v53 = vmax.f32 %v1402_v44, 0.0 }
 0x264   :  { %v2082_v47 = vpop.f32.mrf.mxu1 }
 0x265   :  { %v1437_v49 = vmax.f32 %v1405_v45, 0.0  ;;  %v1403_v50 = vadd.f32 %v2553_v19, %v1284_v46  ;;  %v1305_v51 = vadd.f32 %v2082_v47, %v2034_v57 }
 0x266   :  { %v1296_v52 = vpop.f32.mrf.mxu1 }
 0x267   :  { %v1771_v54 = vpack.c.bf16 %v1437_v49, %v1436_v48  ;;  %v1435_v17 = vmax.f32 %v1403_v50, 0.0  ;;  %v1297_v18 = vadd.f32 %v1296_v52, %v2504_v58  ;;  %v1408_v21 = vadd.f32 %v2553_v19, %v1305_v51 }
 0x268   :  { %v2083_v55 = vpop.f32.mrf.mxu1 }
 0x269   :  { %1835 = vst [vmem:[#allocation9 + $0x18] sm:$0xff] %v1771_v54   ;;  %v1766_v20 = vpack.c.bf16 %v1435_v17, %v1434_v53  ;;  %v1308_v22 = vadd.f32 %v2083_v55, %v2506_v59  ;;  %v1406_v23 = vadd.f32 %v2553_v19, %v1297_v18  ;;  %v1440_v26 = vmax.f32 %v1408_v21, 0.0 }
 0x26a   :  { %v1299_v56 = vpop.f32.mrf.mxu1 }
 0x26b   :  { %1834 = vst [vmem:[#allocation9 + $0x10] sm:$0xff] %v1766_v20   ;;  %v1409_v24 = vadd.f32 %v2553_v19, %v1308_v22  ;;  %v1300_v57 = vadd.f32 %v1299_v56, %v2508_v60  ;;  %v1438_v30 = vmax.f32 %v1406_v23, 0.0 }
 0x26c   :  { %v2086_v25 = vpop.f32.mrf.mxu1 }
 0x26d   :  { %v1441_v27 = vmax.f32 %v1409_v24, 0.0  ;;  %v1407_v58 = vadd.f32 %v2553_v19, %v1300_v57  ;;  %v1321_v28 = vadd.f32 %v2086_v25, %v2510_v61 }
 0x26e   :  { %v1312_v29 = vpop.f32.mrf.mxu1 }
 0x26f   :  { %v1781_v31 = vpack.c.bf16 %v1441_v27, %v1440_v26  ;;  %v1439_v32 = vmax.f32 %v1407_v58, 0.0  ;;  %v1313_v59 = vadd.f32 %v1312_v29, %v2512_v62  ;;  %v1412_v35 = vadd.f32 %v2553_v19, %v1321_v28 }
 0x270   :  { %v2087_v33 = vpop.f32.mrf.mxu1 }
 0x271   :  { %1837 = vst [vmem:[#allocation9 + $0x28] sm:$0xff] %v1781_v31   ;;  %v1776_v34 = vpack.c.bf16 %v1439_v32, %v1438_v30  ;;  %v1324_v60 = vadd.f32 %v2087_v33, %v2514_v63  ;;  %v1410_v37 = vadd.f32 %v2553_v19, %v1313_v59  ;;  %v1444_v40 = vmax.f32 %v1412_v35, 0.0 }
 0x272   :  { %v1315_v36 = vpop.f32.mrf.mxu1 }
 0x273   :  { %1836 = vst [vmem:[#allocation9 + $0x20] sm:$0xff] %v1776_v34   ;;  %v1413_v38 = vadd.f32 %v2553_v19, %v1324_v60  ;;  %v1316_v61 = vadd.f32 %v1315_v36, %v2516_v0  ;;  %v1442_v44 = vmax.f32 %v1410_v37, 0.0 }
 0x274   :  { %v2090_v39 = vpop.f32.mrf.mxu1 }
 0x275   :  { %v1445_v41 = vmax.f32 %v1413_v38, 0.0  ;;  %v1411_v62 = vadd.f32 %v2553_v19, %v1316_v61  ;;  %v1337_v42 = vadd.f32 %v2090_v39, %v2518_v1 }
 0x276   :  { %v1328_v43 = vpop.f32.mrf.mxu1 }
 0x277   :  { %v1791_v45 = vpack.c.bf16 %v1445_v41, %v1444_v40  ;;  %v1443_v46 = vmax.f32 %v1411_v62, 0.0  ;;  %v1329_v63 = vadd.f32 %v1328_v43, %v2520_v2  ;;  %v1416_v49 = vadd.f32 %v2553_v19, %v1337_v42 }
 0x278   :  { %v2091_v47 = vpop.f32.mrf.mxu1 }
 0x279   :  { %1839 = vst [vmem:[#allocation9 + $0x38] sm:$0xff] %v1791_v45   ;;  %v1786_v48 = vpack.c.bf16 %v1443_v46, %v1442_v44  ;;  %v1340_v0 = vadd.f32 %v2091_v47, %v2522_v3  ;;  %v1414_v51 = vadd.f32 %v2553_v19, %v1329_v63  ;;  %v1448_v54 = vmax.f32 %v1416_v49, 0.0 }
 0x27a   :  { %v1331_v50 = vpop.f32.mrf.mxu1 }
 0x27b   :  { %1838 = vst [vmem:[#allocation9 + $0x30] sm:$0xff] %v1786_v48   ;;  %v1417_v52 = vadd.f32 %v2553_v19, %v1340_v0  ;;  %v1332_v1 = vadd.f32 %v1331_v50, %v2524_v4  ;;  %v1446_v20 = vmax.f32 %v1414_v51, 0.0 }
 0x27c   :  { %v2094_v53 = vpop.f32.mrf.mxu1 }
 0x27d   :  { %v1449_v17 = vmax.f32 %v1417_v52, 0.0  ;;  %v1415_v2 = vadd.f32 %v2553_v19, %v1332_v1  ;;  %v1353_v18 = vadd.f32 %v2094_v53, %v2526_v5 }
 0x27e   :  { %v1344_v55 = vpop.f32.mrf.mxu1 }
 0x27f   :  { %v1801_v21 = vpack.c.bf16 %v1449_v17, %v1448_v54  ;;  %v1447_v22 = vmax.f32 %v1415_v2, 0.0  ;;  %v1345_v3 = vadd.f32 %v1344_v55, %v2528_v6  ;;  %v1420_v24 = vadd.f32 %v2553_v19, %v1353_v18 }
 0x280   :  { %v2095_v56 = vpop.f32.mrf.mxu1 }
 0x281   :  { %1841 = vst [vmem:[#allocation9 + $0x48] sm:$0xff] %v1801_v21   ;;  %v1796_v23 = vpack.c.bf16 %v1447_v22, %v1446_v20  ;;  %v1356_v4 = vadd.f32 %v2095_v56, %v2530_v7  ;;  %v1418_v25 = vadd.f32 %v2553_v19, %v1345_v3  ;;  %v1452_v58 = vmax.f32 %v1420_v24, 0.0 }
 0x282   :  { %v1347_v57 = vpop.f32.mrf.mxu1 }
 0x283   :  { %1840 = vst [vmem:[#allocation9 + $0x40] sm:$0xff] %v1796_v23   ;;  %v1421_v26 = vadd.f32 %v2553_v19, %v1356_v4  ;;  %v1348_v5 = vadd.f32 %v1347_v57, %v2532_v8  ;;  %v1450_v31 = vmax.f32 %v1418_v25, 0.0 }
 0x284   :  { %v2098_v27 = vpop.f32.mrf.mxu1 }
 0x285   :  { %v1453_v28 = vmax.f32 %v1421_v26, 0.0  ;;  %v1419_v6 = vadd.f32 %v2553_v19, %v1348_v5  ;;  %v1369_v29 = vadd.f32 %v2098_v27, %v2534_v9 }
 0x286   :  { %v1360_v30 = vpop.f32.mrf.mxu1 }
 0x287   :  { %v1811_v32 = vpack.c.bf16 %v1453_v28, %v1452_v58  ;;  %v1451_v59 = vmax.f32 %v1419_v6, 0.0  ;;  %v1361_v7 = vadd.f32 %v1360_v30, %v2536_v10  ;;  %v1424_v35 = vadd.f32 %v2553_v19, %v1369_v29 }
 0x288   :  { %v2099_v33 = vpop.f32.mrf.mxu1 }
 0x289   :  { %1843 = vst [vmem:[#allocation9 + $0x58] sm:$0xff] %v1811_v32   ;;  %v1806_v34 = vpack.c.bf16 %v1451_v59, %v1450_v31  ;;  %v1372_v8 = vadd.f32 %v2099_v33, %v2538_v11  ;;  %v1422_v36 = vadd.f32 %v2553_v19, %v1361_v7  ;;  %v1456_v61 = vmax.f32 %v1424_v35, 0.0 }
 0x28a   :  { %v1363_v60 = vpop.f32.mrf.mxu1 }
 0x28b   :  { %1842 = vst [vmem:[#allocation9 + $0x50] sm:$0xff] %v1806_v34   ;;  %v1425_v37 = vadd.f32 %v2553_v19, %v1372_v8  ;;  %v1364_v9 = vadd.f32 %v1363_v60, %v2540_v12  ;;  %v1454_v62 = vmax.f32 %v1422_v36, 0.0 }
 0x28c   :  { %v2102_v38 = vpop.f32.mrf.mxu1 }
 0x28d   :  { %v1457_v39 = vmax.f32 %v1425_v37, 0.0  ;;  %v1423_v10 = vadd.f32 %v2553_v19, %v1364_v9  ;;  %v1385_v40 = vadd.f32 %v2102_v38, %v2542_v13 }
 0x28e   :  { %v1376_v41 = vpop.f32.mrf.mxu1 }
 0x28f   :  { %v1821_v42 = vpack.c.bf16 %v1457_v39, %v1456_v61  ;;  %v1455_v43 = vmax.f32 %v1423_v10, 0.0  ;;  %v1377_v11 = vadd.f32 %v1376_v41, %v2544_v14  ;;  %v1428_v46 = vadd.f32 %v2553_v19, %v1385_v40 }
 0x290   :  { %v2103_v44 = vpop.f32.mrf.mxu1 }
 0x291   :  { %1845 = vst [vmem:[#allocation9 + $0x68] sm:$0xff] %v1821_v42   ;;  %v1816_v45 = vpack.c.bf16 %v1455_v43, %v1454_v62  ;;  %v1388_v12 = vadd.f32 %v2103_v44, %v2546_v15  ;;  %v1426_v47 = vadd.f32 %v2553_v19, %v1377_v11  ;;  %v1460_v49 = vmax.f32 %v1428_v46, 0.0 }
 0x292   :  { %v1379_v63 = vpop.f32.mrf.mxu1 }
 0x293   :  { %1844 = vst [vmem:[#allocation9 + $0x60] sm:$0xff] %v1816_v45   ;;  %v1429_v48 = vadd.f32 %v2553_v19, %v1388_v12  ;;  %v1380_v13 = vadd.f32 %v1379_v63, %v2548_v16  ;;  %v1458_v14 = vmax.f32 %v1426_v47, 0.0 }
 0x295   :  { %v1461_v0 = vmax.f32 %v1429_v48, 0.0  ;;  %v1427_v50 = vadd.f32 %v2553_v19, %v1380_v13 }
 0x297   :  { %v1831_v51 = vpack.c.bf16 %v1461_v0, %v1460_v49  ;;  %v1459_v52 = vmax.f32 %v1427_v50, 0.0 }
 0x299   :  { %1847 = vst [vmem:[#allocation9 + $0x78] sm:$0xff] %v1831_v51   ;;  %v1826_v1 = vpack.c.bf16 %v1459_v52, %v1458_v14 }
 0x29b   :  { %1846 = vst [vmem:[#allocation9 + $0x70] sm:$0xff] %v1826_v1  }
 0x29c   :  { %2232 = shalt.err (!%p2229_p5)
}
 0x29d   :  { %1633 = dma.vmem_to_hbm [thread:$0]  %s1628_s1, 2048, %s2623_s7, [#allocation5], %s2249_s29, %s2249_s29, %s2250_s30  }
 0x29e   :  { %2245 = dma.done.wait [#allocation5], 2048  }
 0x29f   :  { %2246 = vsyncadd [#allocation5], 4294965248 }
 0x2a0   :  { %1637 = vsyncpa [#allocation4], 1 }
 0x2a1   :  { %1638 = vsyncpa [#allocation7], 1 }
 0x2a2   :  { %1639 = vsyncpa [#allocation5], 1 }

</bundles_post_ra>
